<compile_context>
chip_gen: v7x
topology: tpu7x:2x2x1
jax: 0.10.0
libtpu: 0.0.40
codegen_flags: <defaults>
</compile_context>

<pallas_src>
import math

import jax
import jax.numpy as jnp
from jax.experimental import pallas as pl
from jax.experimental.pallas import tpu as pltpu

NUM_STATES = 4      # env.observation_space.shape[0] (synthetic)
N_ACTION = 2
H = 16              # lstm_i_dim == lstm_h_dim == 16
FC1_OUT = 200
LANES = 256         # parameter-slab lane width (>= 200, multiple of 128)
OUT_LANES = 128     # lane-dense output slab width


def _align8(n):
    return (n + 7) & ~7


# Static row offsets of every parameter inside the packed slab (sublane-aligned).
_PARAM_ROWS = [
    ("w1t", NUM_STATES),   # (S, 200)
    ("b1", 1),             # (1, 200)
    ("w2t", FC1_OUT),      # (200, H)
    ("b2", 1),             # (1, H)
    ("wih_t", H),          # (H, 4H)   gate order i,f,o,g
    ("whh_t", H),          # (H, 4H)
    ("blstm", 1),          # (1, 4H)   bih + bhh folded
    ("w3t", H),            # (H, 16)
    ("b3", 1),             # (1, 16)
    ("w4t", 16),           # (16, 128) zero-padded past N_ACTION
    ("b4", 1),             # (1, 128)  zero-padded past N_ACTION
]
_R = {}
_r = 0
for _name, _rows in _PARAM_ROWS:
    _R[_name] = _r
    _r = _align8(_r + _rows)
P_ROWS = _r            # total slab rows (multiple of 8)


def drqn_kernel(x_ref, p_ref, hc0_ref, out_ref):
    TB, _ = x_ref.shape
    B = hc0_ref.shape[1]
    T = TB // B

    # ---- carve the fused parameter slab with static views ------------------
    w1t = p_ref[_R["w1t"]:_R["w1t"] + NUM_STATES, :FC1_OUT]      # (S, 200)
    b1 = p_ref[_R["b1"]:_R["b1"] + 1, :FC1_OUT]                  # (1, 200)
    w2t = p_ref[_R["w2t"]:_R["w2t"] + FC1_OUT, :H]               # (200, H)
    b2 = p_ref[_R["b2"]:_R["b2"] + 1, :H]                        # (1, H)
    wih_t = p_ref[_R["wih_t"]:_R["wih_t"] + H, :4 * H]           # (H, 4H)
    whh_t = p_ref[_R["whh_t"]:_R["whh_t"] + H, :4 * H]           # (H, 4H)
    blstm = p_ref[_R["blstm"]:_R["blstm"] + 1, :4 * H]           # (1, 4H)
    w3t = p_ref[_R["w3t"]:_R["w3t"] + H, :H]                     # (H, 16)
    b3 = p_ref[_R["b3"]:_R["b3"] + 1, :H]                        # (1, 16)
    w4t = p_ref[_R["w4t"]:_R["w4t"] + H, :OUT_LANES]             # (16, 128) lane-padded
    b4 = p_ref[_R["b4"]:_R["b4"] + 1, :OUT_LANES]                # (1, 128)  lane-padded

    x = x_ref[...]                                               # (TB, S)

    # fc1 + relu : (TB, S) @ (S, 200)
    h1 = jnp.maximum(
        jnp.dot(x, w1t, preferred_element_type=jnp.float32) + b1, 0.0)

    # fc2 : (TB, 200) @ (200, H)
    h2 = jnp.dot(h1, w2t, preferred_element_type=jnp.float32) + b2

    # LSTM input contribution for all gates and timesteps at once
    # (bih + bhh folded into blstm; gate columns ordered i,f,o,g).
    gx = jnp.dot(h2, wih_t, preferred_element_type=jnp.float32) + blstm   # (TB, 4H)

    # Hoist the h-independent per-step gate slices out of the recurrence.
    gx_steps = [gx[t * B:(t + 1) * B, :] for t in range(T)]

    h = hc0_ref[0]                                               # (B, H)
    c = hc0_ref[1]                                               # (B, H)

    # Fully-unrolled recurrence; h/c and the per-step outputs stay in vregs.
    hs = []
    for t in range(T):
        # NOTE: on v5e/v6e a VPU broadcast-MAC over K=16 may beat this tiny
        # serial MXU matmul (MRF latency); keep MXU pending a bundle benchmark.
        gates = gx_steps[t] + jnp.dot(
            h, whh_t, preferred_element_type=jnp.float32)        # (B, 4H)
        sg = jax.nn.sigmoid(gates[:, :3 * H])                    # i | f | o
        g = jnp.tanh(gates[:, 3 * H:])
        i = sg[:, 0 * H:1 * H]
        f = sg[:, 1 * H:2 * H]
        o = sg[:, 2 * H:3 * H]
        c = f * c + i * g
        h = o * jnp.tanh(c)
        hs.append(h)

    hseq = jnp.concatenate(hs, axis=0)                           # (TB, H), register-resident

    # fc3 + relu, fc4 : single 2-D matmuls over the whole sequence.
    h4 = jnp.maximum(
        jnp.dot(hseq, w3t, preferred_element_type=jnp.float32) + b3, 0.0)

    # Lane-dense unmasked store of the q-value slab (cols >= N_ACTION are 0
    # because w4t/b4 were zero-padded in the wrapper).
    out_ref[0:TB, :] = jnp.dot(h4, w4t, preferred_element_type=jnp.float32) + b4

    # Fold h_n / c_n into the trailing rows, zero-padded to full lane width.
    tail = jnp.concatenate([h, c], axis=0)                       # (2B, H)
    pad = jnp.zeros((2 * B, OUT_LANES - H), jnp.float32)
    out_ref[TB:TB + 2 * B, :] = jnp.concatenate([tail, pad], axis=1)


def _perm_gates(a, axis):
    """Reorder PyTorch LSTM gate blocks (i, f, g, o) -> (i, f, o, g) along axis."""
    i, f, g, o = jnp.split(a, 4, axis=axis)
    return jnp.concatenate([i, f, o, g], axis=axis)


def pack_params(params):
    """One-time preprocessing: transpose / permute / pad and fuse into one slab."""
    (w1, b1, w2, b2, wih, whh, bih, bhh, w3, b3, w4, b4) = params

    w1t = w1.T                                  # (S, 200)
    w2t = w2.T                                  # (200, H)
    wih_t = _perm_gates(wih, axis=0).T          # (H, 4H), gate order i,f,o,g
    whh_t = _perm_gates(whh, axis=0).T          # (H, 4H)
    b_lstm = _perm_gates(bih + bhh, axis=1)     # (1, 4H)
    w3t = w3.T                                  # (H, 16)
    w4t = jnp.zeros((16, OUT_LANES), jnp.float32).at[:, :N_ACTION].set(w4.T)
    b4p = jnp.zeros((1, OUT_LANES), jnp.float32).at[:, :N_ACTION].set(b4)

    slab = jnp.zeros((P_ROWS, LANES), jnp.float32)

    def put(s, name, a):
        r = _R[name]
        return s.at[r:r + a.shape[0], :a.shape[1]].set(a)

    slab = put(slab, "w1t", w1t)
    slab = put(slab, "b1", b1)
    slab = put(slab, "w2t", w2t)
    slab = put(slab, "b2", b2)
    slab = put(slab, "wih_t", wih_t)
    slab = put(slab, "whh_t", whh_t)
    slab = put(slab, "blstm", b_lstm)
    slab = put(slab, "w3t", w3t)
    slab = put(slab, "b3", b3)
    slab = put(slab, "w4t", w4t)
    slab = put(slab, "b4", b4p)
    return slab


@jax.jit
def drqn_forward(x, p_slab, hidden):
    T, B, S = x.shape
    TB = T * B
    h0, c0 = hidden

    x2d = x.reshape(TB, S)
    hc0 = jnp.concatenate([h0, c0], axis=0)     # (2, B, H)

    vmem = pl.BlockSpec(memory_space=pltpu.MemorySpace.VMEM)

    out_slab = pl.pallas_call(
        drqn_kernel,
        out_shape=jax.ShapeDtypeStruct((TB + 2 * B, OUT_LANES), jnp.float32),
        in_specs=[vmem, vmem, vmem],
        out_specs=vmem,
    )(x2d, p_slab, hc0)

    out = out_slab[:TB, :N_ACTION].reshape(T, B, N_ACTION)
    hn = out_slab[TB:TB + B, :H][None]
    cn = out_slab[TB + B:TB + 2 * B, :H][None]
    return out, (hn, cn)


def drqn_reference(x, params, hidden):
    """Pure-JAX reference matching torch semantics (for sanity checking)."""
    (w1, b1, w2, b2, wih, whh, bih, bhh, w3, b3, w4, b4) = params
    h, c = hidden[0][0], hidden[1][0]
    h1 = jnp.maximum(jnp.einsum('tbs,os->tbo', x, w1) + b1, 0.0)
    h2 = jnp.einsum('tbs,os->tbo', h1, w2) + b2
    hs = []
    for t in range(x.shape[0]):
        gates = h2[t] @ wih.T + bih + h @ whh.T + bhh
        i = jax.nn.sigmoid(gates[:, 0 * H:1 * H])
        f = jax.nn.sigmoid(gates[:, 1 * H:2 * H])
        g = jnp.tanh(gates[:, 2 * H:3 * H])
        o = jax.nn.sigmoid(gates[:, 3 * H:4 * H])
        c = f * c + i * g
        h = o * jnp.tanh(c)
        hs.append(h)
    hseq = jnp.stack(hs, axis=0)
    h4 = jnp.maximum(jnp.einsum('tbh,oh->tbo', hseq, w3) + b3, 0.0)
    h5 = jnp.einsum('tbh,oh->tbo', h4, w4) + b4
    return h5, (h[None], c[None])


def init_params(key):
    ks = jax.random.split(key, 12)

    def unif(k, shape, lo, hi):
        return jax.random.uniform(k, shape, jnp.float32, lo, hi)

    # fc1: weight explicitly uniform_(0, 1) in the torch module; default bias init.
    kb1 = 1.0 / math.sqrt(NUM_STATES)
    w1 = unif(ks[0], (FC1_OUT, NUM_STATES), 0.0, 1.0)
    b1 = unif(ks[1], (1, FC1_OUT), -kb1, kb1)

    # fc2: weight uniform_(0, 1); default bias init.
    kb2 = 1.0 / math.sqrt(FC1_OUT)
    w2 = unif(ks[2], (H, FC1_OUT), 0.0, 1.0)
    b2 = unif(ks[3], (1, H), -kb2, kb2)

    # LSTM (single layer): default uniform(-1/sqrt(H), 1/sqrt(H)); gate order i,f,g,o.
    kl = 1.0 / math.sqrt(H)
    wih = unif(ks[4], (4 * H, H), -kl, kl)
    whh = unif(ks[5], (4 * H, H), -kl, kl)
    bih = unif(ks[6], (1, 4 * H), -kl, kl)
    bhh = unif(ks[7], (1, 4 * H), -kl, kl)

    # fc3, fc4: default torch Linear init.
    kb3 = 1.0 / math.sqrt(H)
    w3 = unif(ks[8], (16, H), -kb3, kb3)
    b3 = unif(ks[9], (1, 16), -kb3, kb3)
    kb4 = 1.0 / math.sqrt(16)
    w4 = unif(ks[10], (N_ACTION, 16), -kb4, kb4)
    b4 = unif(ks[11], (1, N_ACTION), -kb4, kb4)

    return (w1, b1, w2, b2, wih, whh, bih, bhh, w3, b3, w4, b4)


if __name__ == "__main__":
    T, B = 8, 8                 # B=8 -> sublane-full batch (amortizes per-call cost)
    key = jax.random.PRNGKey(0)
    k_x, k_p = jax.random.split(key)

    x = jax.random.normal(k_x, (T, B, NUM_STATES), jnp.float32)
    params = init_params(k_p)
    h0 = jnp.zeros((1, B, H), jnp.float32)
    c0 = jnp.zeros((1, B, H), jnp.float32)

    # One-time parameter packing (hoisted out of the per-call path).
    p_slab = jax.block_until_ready(pack_params(params))

    out, (hn, cn) = drqn_forward(x, p_slab, (h0, c0))
    out = jax.block_until_ready(out)
    hn = jax.block_until_ready(hn)
    cn = jax.block_until_ready(cn)

    out_ref, (hn_ref, cn_ref) = drqn_reference(x, params, (h0, c0))
    assert out.shape == (T, B, N_ACTION)
    assert hn.shape == (1, B, H) and cn.shape == (1, B, H)
    assert jnp.allclose(out, out_ref, atol=1e-3, rtol=1e-3), "q-value mismatch vs reference"
    assert jnp.allclose(hn, hn_ref, atol=1e-3, rtol=1e-3), "h_n mismatch vs reference"
    assert jnp.allclose(cn, cn_ref, atol=1e-3, rtol=1e-3), "c_n mismatch vs reference"

    print("KERNEL_OK")
</pallas_src>

<mosaic_0001>
module attributes {stable_mosaic.version = 11 : i64} {
  func.func @drqn_kernel(%arg0: memref<64x4xf32, #tpu.memory_space<vmem>>, %arg1: memref<312x256xf32, #tpu.memory_space<vmem>>, %arg2: memref<2x8x16xf32, #tpu.memory_space<vmem>>, %arg3: memref<80x128xf32, #tpu.memory_space<vmem>>) attributes {dimension_semantics = [], scalar_prefetch = 0 : i64, scratch_operands = 0 : i64, tpu.core_type = #tpu.core_type<tc>} {
    %c0 = arith.constant 0 : index
    %c0_0 = arith.constant 0 : index
    %0 = vector.load %arg1[%c0, %c0_0] : memref<312x256xf32, #tpu.memory_space<vmem>>, vector<4x200xf32>
    %c8 = arith.constant 8 : index
    %c0_1 = arith.constant 0 : index
    %1 = vector.load %arg1[%c8, %c0_1] : memref<312x256xf32, #tpu.memory_space<vmem>>, vector<1x200xf32>
    %c16 = arith.constant 16 : index
    %c0_2 = arith.constant 0 : index
    %2 = vector.load %arg1[%c16, %c0_2] : memref<312x256xf32, #tpu.memory_space<vmem>>, vector<200x16xf32>
    %c216 = arith.constant 216 : index
    %c0_3 = arith.constant 0 : index
    %3 = vector.load %arg1[%c216, %c0_3] : memref<312x256xf32, #tpu.memory_space<vmem>>, vector<1x16xf32>
    %c224 = arith.constant 224 : index
    %c0_4 = arith.constant 0 : index
    %4 = vector.load %arg1[%c224, %c0_4] : memref<312x256xf32, #tpu.memory_space<vmem>>, vector<16x64xf32>
    %c240 = arith.constant 240 : index
    %c0_5 = arith.constant 0 : index
    %5 = vector.load %arg1[%c240, %c0_5] : memref<312x256xf32, #tpu.memory_space<vmem>>, vector<16x64xf32>
    %c256 = arith.constant 256 : index
    %c0_6 = arith.constant 0 : index
    %6 = vector.load %arg1[%c256, %c0_6] : memref<312x256xf32, #tpu.memory_space<vmem>>, vector<1x64xf32>
    %c264 = arith.constant 264 : index
    %c0_7 = arith.constant 0 : index
    %7 = vector.load %arg1[%c264, %c0_7] : memref<312x256xf32, #tpu.memory_space<vmem>>, vector<16x16xf32>
    %c280 = arith.constant 280 : index
    %c0_8 = arith.constant 0 : index
    %8 = vector.load %arg1[%c280, %c0_8] : memref<312x256xf32, #tpu.memory_space<vmem>>, vector<1x16xf32>
    %c288 = arith.constant 288 : index
    %c0_9 = arith.constant 0 : index
    %9 = vector.load %arg1[%c288, %c0_9] : memref<312x256xf32, #tpu.memory_space<vmem>>, vector<16x128xf32>
    %c304 = arith.constant 304 : index
    %c0_10 = arith.constant 0 : index
    %10 = vector.load %arg1[%c304, %c0_10] : memref<312x256xf32, #tpu.memory_space<vmem>>, vector<1x128xf32>
    %c0_11 = arith.constant 0 : index
    %c0_12 = arith.constant 0 : index
    %11 = vector.load %arg0[%c0_11, %c0_12] : memref<64x4xf32, #tpu.memory_space<vmem>>, vector<64x4xf32>
    %cst = arith.constant dense<0.000000e+00> : vector<64x200xf32>
    %12 = tpu.matmul %11, %0, %cst {dimension_numbers = #tpu.dot_dimension_numbers<[1], [0], [0], [1], [0, 0, 1, 1], [], []>} : vector<64x4xf32>, vector<4x200xf32>, vector<64x200xf32> -> vector<64x200xf32>
    %13 = vector.broadcast %1 : vector<1x200xf32> to vector<64x200xf32>
    %14 = arith.addf %12, %13 : vector<64x200xf32>
    %cst_13 = arith.constant 0.000000e+00 : f32
    %15 = vector.broadcast %cst_13 : f32 to vector<64x200xf32>
    %16 = arith.maximumf %14, %15 : vector<64x200xf32>
    %cst_14 = arith.constant dense<0.000000e+00> : vector<64x16xf32>
    %17 = tpu.matmul %16, %2, %cst_14 {dimension_numbers = #tpu.dot_dimension_numbers<[1], [0], [0], [1], [0, 0, 1, 1], [], []>} : vector<64x200xf32>, vector<200x16xf32>, vector<64x16xf32> -> vector<64x16xf32>
    %18 = vector.broadcast %3 : vector<1x16xf32> to vector<64x16xf32>
    %19 = arith.addf %17, %18 : vector<64x16xf32>
    %cst_15 = arith.constant dense<0.000000e+00> : vector<64x64xf32>
    %20 = tpu.matmul %19, %4, %cst_15 {dimension_numbers = #tpu.dot_dimension_numbers<[1], [0], [0], [1], [0, 0, 1, 1], [], []>} : vector<64x16xf32>, vector<16x64xf32>, vector<64x64xf32> -> vector<64x64xf32>
    %21 = vector.broadcast %6 : vector<1x64xf32> to vector<64x64xf32>
    %22 = arith.addf %20, %21 : vector<64x64xf32>
    %23 = vector.extract_strided_slice %22 {offsets = [0, 0], sizes = [8, 64], strides = [1, 1]} : vector<64x64xf32> to vector<8x64xf32>
    %24 = vector.extract_strided_slice %22 {offsets = [8, 0], sizes = [8, 64], strides = [1, 1]} : vector<64x64xf32> to vector<8x64xf32>
    %25 = vector.extract_strided_slice %22 {offsets = [16, 0], sizes = [8, 64], strides = [1, 1]} : vector<64x64xf32> to vector<8x64xf32>
    %26 = vector.extract_strided_slice %22 {offsets = [24, 0], sizes = [8, 64], strides = [1, 1]} : vector<64x64xf32> to vector<8x64xf32>
    %27 = vector.extract_strided_slice %22 {offsets = [32, 0], sizes = [8, 64], strides = [1, 1]} : vector<64x64xf32> to vector<8x64xf32>
    %28 = vector.extract_strided_slice %22 {offsets = [40, 0], sizes = [8, 64], strides = [1, 1]} : vector<64x64xf32> to vector<8x64xf32>
    %29 = vector.extract_strided_slice %22 {offsets = [48, 0], sizes = [8, 64], strides = [1, 1]} : vector<64x64xf32> to vector<8x64xf32>
    %30 = vector.extract_strided_slice %22 {offsets = [56, 0], sizes = [8, 64], strides = [1, 1]} : vector<64x64xf32> to vector<8x64xf32>
    %c0_16 = arith.constant 0 : index
    %c0_17 = arith.constant 0 : index
    %c0_18 = arith.constant 0 : index
    %31 = vector.load %arg2[%c0_16, %c0_17, %c0_18] : memref<2x8x16xf32, #tpu.memory_space<vmem>>, vector<1x8x16xf32>
    %32 = vector.shape_cast %31 : vector<1x8x16xf32> to vector<8x16xf32>
    %c1 = arith.constant 1 : index
    %c0_19 = arith.constant 0 : index
    %c0_20 = arith.constant 0 : index
    %33 = vector.load %arg2[%c1, %c0_19, %c0_20] : memref<2x8x16xf32, #tpu.memory_space<vmem>>, vector<1x8x16xf32>
    %34 = vector.shape_cast %33 : vector<1x8x16xf32> to vector<8x16xf32>
    %cst_21 = arith.constant dense<0.000000e+00> : vector<8x64xf32>
    %35 = tpu.matmul %32, %5, %cst_21 {dimension_numbers = #tpu.dot_dimension_numbers<[1], [0], [0], [1], [0, 0, 1, 1], [], []>} : vector<8x16xf32>, vector<16x64xf32>, vector<8x64xf32> -> vector<8x64xf32>
    %36 = arith.addf %23, %35 : vector<8x64xf32>
    %37 = vector.extract_strided_slice %36 {offsets = [0, 0], sizes = [8, 48], strides = [1, 1]} : vector<8x64xf32> to vector<8x48xf32>
    %38 = arith.negf %37 : vector<8x48xf32>
    %39 = math.exp %38 : vector<8x48xf32>
    %cst_22 = arith.constant 1.000000e+00 : f32
    %40 = vector.broadcast %cst_22 : f32 to vector<8x48xf32>
    %41 = arith.addf %40, %39 : vector<8x48xf32>
    %42 = arith.divf %40, %41 : vector<8x48xf32>
    %43 = vector.extract_strided_slice %36 {offsets = [0, 48], sizes = [8, 16], strides = [1, 1]} : vector<8x64xf32> to vector<8x16xf32>
    %44 = math.tanh %43 : vector<8x16xf32>
    %45 = vector.extract_strided_slice %42 {offsets = [0, 0], sizes = [8, 16], strides = [1, 1]} : vector<8x48xf32> to vector<8x16xf32>
    %46 = vector.extract_strided_slice %42 {offsets = [0, 16], sizes = [8, 16], strides = [1, 1]} : vector<8x48xf32> to vector<8x16xf32>
    %47 = vector.extract_strided_slice %42 {offsets = [0, 32], sizes = [8, 16], strides = [1, 1]} : vector<8x48xf32> to vector<8x16xf32>
    %48 = arith.mulf %46, %34 : vector<8x16xf32>
    %49 = arith.mulf %45, %44 : vector<8x16xf32>
    %50 = arith.addf %48, %49 : vector<8x16xf32>
    %51 = math.tanh %50 : vector<8x16xf32>
    %52 = arith.mulf %47, %51 : vector<8x16xf32>
    %cst_23 = arith.constant dense<0.000000e+00> : vector<8x64xf32>
    %53 = tpu.matmul %52, %5, %cst_23 {dimension_numbers = #tpu.dot_dimension_numbers<[1], [0], [0], [1], [0, 0, 1, 1], [], []>} : vector<8x16xf32>, vector<16x64xf32>, vector<8x64xf32> -> vector<8x64xf32>
    %54 = arith.addf %24, %53 : vector<8x64xf32>
    %55 = vector.extract_strided_slice %54 {offsets = [0, 0], sizes = [8, 48], strides = [1, 1]} : vector<8x64xf32> to vector<8x48xf32>
    %56 = arith.negf %55 : vector<8x48xf32>
    %57 = math.exp %56 : vector<8x48xf32>
    %cst_24 = arith.constant 1.000000e+00 : f32
    %58 = vector.broadcast %cst_24 : f32 to vector<8x48xf32>
    %59 = arith.addf %58, %57 : vector<8x48xf32>
    %60 = arith.divf %58, %59 : vector<8x48xf32>
    %61 = vector.extract_strided_slice %54 {offsets = [0, 48], sizes = [8, 16], strides = [1, 1]} : vector<8x64xf32> to vector<8x16xf32>
    %62 = math.tanh %61 : vector<8x16xf32>
    %63 = vector.extract_strided_slice %60 {offsets = [0, 0], sizes = [8, 16], strides = [1, 1]} : vector<8x48xf32> to vector<8x16xf32>
    %64 = vector.extract_strided_slice %60 {offsets = [0, 16], sizes = [8, 16], strides = [1, 1]} : vector<8x48xf32> to vector<8x16xf32>
    %65 = vector.extract_strided_slice %60 {offsets = [0, 32], sizes = [8, 16], strides = [1, 1]} : vector<8x48xf32> to vector<8x16xf32>
    %66 = arith.mulf %64, %50 : vector<8x16xf32>
    %67 = arith.mulf %63, %62 : vector<8x16xf32>
    %68 = arith.addf %66, %67 : vector<8x16xf32>
    %69 = math.tanh %68 : vector<8x16xf32>
    %70 = arith.mulf %65, %69 : vector<8x16xf32>
    %cst_25 = arith.constant dense<0.000000e+00> : vector<8x64xf32>
    %71 = tpu.matmul %70, %5, %cst_25 {dimension_numbers = #tpu.dot_dimension_numbers<[1], [0], [0], [1], [0, 0, 1, 1], [], []>} : vector<8x16xf32>, vector<16x64xf32>, vector<8x64xf32> -> vector<8x64xf32>
    %72 = arith.addf %25, %71 : vector<8x64xf32>
    %73 = vector.extract_strided_slice %72 {offsets = [0, 0], sizes = [8, 48], strides = [1, 1]} : vector<8x64xf32> to vector<8x48xf32>
    %74 = arith.negf %73 : vector<8x48xf32>
    %75 = math.exp %74 : vector<8x48xf32>
    %cst_26 = arith.constant 1.000000e+00 : f32
    %76 = vector.broadcast %cst_26 : f32 to vector<8x48xf32>
    %77 = arith.addf %76, %75 : vector<8x48xf32>
    %78 = arith.divf %76, %77 : vector<8x48xf32>
    %79 = vector.extract_strided_slice %72 {offsets = [0, 48], sizes = [8, 16], strides = [1, 1]} : vector<8x64xf32> to vector<8x16xf32>
    %80 = math.tanh %79 : vector<8x16xf32>
    %81 = vector.extract_strided_slice %78 {offsets = [0, 0], sizes = [8, 16], strides = [1, 1]} : vector<8x48xf32> to vector<8x16xf32>
    %82 = vector.extract_strided_slice %78 {offsets = [0, 16], sizes = [8, 16], strides = [1, 1]} : vector<8x48xf32> to vector<8x16xf32>
    %83 = vector.extract_strided_slice %78 {offsets = [0, 32], sizes = [8, 16], strides = [1, 1]} : vector<8x48xf32> to vector<8x16xf32>
    %84 = arith.mulf %82, %68 : vector<8x16xf32>
    %85 = arith.mulf %81, %80 : vector<8x16xf32>
    %86 = arith.addf %84, %85 : vector<8x16xf32>
    %87 = math.tanh %86 : vector<8x16xf32>
    %88 = arith.mulf %83, %87 : vector<8x16xf32>
    %cst_27 = arith.constant dense<0.000000e+00> : vector<8x64xf32>
    %89 = tpu.matmul %88, %5, %cst_27 {dimension_numbers = #tpu.dot_dimension_numbers<[1], [0], [0], [1], [0, 0, 1, 1], [], []>} : vector<8x16xf32>, vector<16x64xf32>, vector<8x64xf32> -> vector<8x64xf32>
    %90 = arith.addf %26, %89 : vector<8x64xf32>
    %91 = vector.extract_strided_slice %90 {offsets = [0, 0], sizes = [8, 48], strides = [1, 1]} : vector<8x64xf32> to vector<8x48xf32>
    %92 = arith.negf %91 : vector<8x48xf32>
    %93 = math.exp %92 : vector<8x48xf32>
    %cst_28 = arith.constant 1.000000e+00 : f32
    %94 = vector.broadcast %cst_28 : f32 to vector<8x48xf32>
    %95 = arith.addf %94, %93 : vector<8x48xf32>
    %96 = arith.divf %94, %95 : vector<8x48xf32>
    %97 = vector.extract_strided_slice %90 {offsets = [0, 48], sizes = [8, 16], strides = [1, 1]} : vector<8x64xf32> to vector<8x16xf32>
    %98 = math.tanh %97 : vector<8x16xf32>
    %99 = vector.extract_strided_slice %96 {offsets = [0, 0], sizes = [8, 16], strides = [1, 1]} : vector<8x48xf32> to vector<8x16xf32>
    %100 = vector.extract_strided_slice %96 {offsets = [0, 16], sizes = [8, 16], strides = [1, 1]} : vector<8x48xf32> to vector<8x16xf32>
    %101 = vector.extract_strided_slice %96 {offsets = [0, 32], sizes = [8, 16], strides = [1, 1]} : vector<8x48xf32> to vector<8x16xf32>
    %102 = arith.mulf %100, %86 : vector<8x16xf32>
    %103 = arith.mulf %99, %98 : vector<8x16xf32>
    %104 = arith.addf %102, %103 : vector<8x16xf32>
    %105 = math.tanh %104 : vector<8x16xf32>
    %106 = arith.mulf %101, %105 : vector<8x16xf32>
    %cst_29 = arith.constant dense<0.000000e+00> : vector<8x64xf32>
    %107 = tpu.matmul %106, %5, %cst_29 {dimension_numbers = #tpu.dot_dimension_numbers<[1], [0], [0], [1], [0, 0, 1, 1], [], []>} : vector<8x16xf32>, vector<16x64xf32>, vector<8x64xf32> -> vector<8x64xf32>
    %108 = arith.addf %27, %107 : vector<8x64xf32>
    %109 = vector.extract_strided_slice %108 {offsets = [0, 0], sizes = [8, 48], strides = [1, 1]} : vector<8x64xf32> to vector<8x48xf32>
    %110 = arith.negf %109 : vector<8x48xf32>
    %111 = math.exp %110 : vector<8x48xf32>
    %cst_30 = arith.constant 1.000000e+00 : f32
    %112 = vector.broadcast %cst_30 : f32 to vector<8x48xf32>
    %113 = arith.addf %112, %111 : vector<8x48xf32>
    %114 = arith.divf %112, %113 : vector<8x48xf32>
    %115 = vector.extract_strided_slice %108 {offsets = [0, 48], sizes = [8, 16], strides = [1, 1]} : vector<8x64xf32> to vector<8x16xf32>
    %116 = math.tanh %115 : vector<8x16xf32>
    %117 = vector.extract_strided_slice %114 {offsets = [0, 0], sizes = [8, 16], strides = [1, 1]} : vector<8x48xf32> to vector<8x16xf32>
    %118 = vector.extract_strided_slice %114 {offsets = [0, 16], sizes = [8, 16], strides = [1, 1]} : vector<8x48xf32> to vector<8x16xf32>
    %119 = vector.extract_strided_slice %114 {offsets = [0, 32], sizes = [8, 16], strides = [1, 1]} : vector<8x48xf32> to vector<8x16xf32>
    %120 = arith.mulf %118, %104 : vector<8x16xf32>
    %121 = arith.mulf %117, %116 : vector<8x16xf32>
    %122 = arith.addf %120, %121 : vector<8x16xf32>
    %123 = math.tanh %122 : vector<8x16xf32>
    %124 = arith.mulf %119, %123 : vector<8x16xf32>
    %cst_31 = arith.constant dense<0.000000e+00> : vector<8x64xf32>
    %125 = tpu.matmul %124, %5, %cst_31 {dimension_numbers = #tpu.dot_dimension_numbers<[1], [0], [0], [1], [0, 0, 1, 1], [], []>} : vector<8x16xf32>, vector<16x64xf32>, vector<8x64xf32> -> vector<8x64xf32>
    %126 = arith.addf %28, %125 : vector<8x64xf32>
    %127 = vector.extract_strided_slice %126 {offsets = [0, 0], sizes = [8, 48], strides = [1, 1]} : vector<8x64xf32> to vector<8x48xf32>
    %128 = arith.negf %127 : vector<8x48xf32>
    %129 = math.exp %128 : vector<8x48xf32>
    %cst_32 = arith.constant 1.000000e+00 : f32
    %130 = vector.broadcast %cst_32 : f32 to vector<8x48xf32>
    %131 = arith.addf %130, %129 : vector<8x48xf32>
    %132 = arith.divf %130, %131 : vector<8x48xf32>
    %133 = vector.extract_strided_slice %126 {offsets = [0, 48], sizes = [8, 16], strides = [1, 1]} : vector<8x64xf32> to vector<8x16xf32>
    %134 = math.tanh %133 : vector<8x16xf32>
    %135 = vector.extract_strided_slice %132 {offsets = [0, 0], sizes = [8, 16], strides = [1, 1]} : vector<8x48xf32> to vector<8x16xf32>
    %136 = vector.extract_strided_slice %132 {offsets = [0, 16], sizes = [8, 16], strides = [1, 1]} : vector<8x48xf32> to vector<8x16xf32>
    %137 = vector.extract_strided_slice %132 {offsets = [0, 32], sizes = [8, 16], strides = [1, 1]} : vector<8x48xf32> to vector<8x16xf32>
    %138 = arith.mulf %136, %122 : vector<8x16xf32>
    %139 = arith.mulf %135, %134 : vector<8x16xf32>
    %140 = arith.addf %138, %139 : vector<8x16xf32>
    %141 = math.tanh %140 : vector<8x16xf32>
    %142 = arith.mulf %137, %141 : vector<8x16xf32>
    %cst_33 = arith.constant dense<0.000000e+00> : vector<8x64xf32>
    %143 = tpu.matmul %142, %5, %cst_33 {dimension_numbers = #tpu.dot_dimension_numbers<[1], [0], [0], [1], [0, 0, 1, 1], [], []>} : vector<8x16xf32>, vector<16x64xf32>, vector<8x64xf32> -> vector<8x64xf32>
    %144 = arith.addf %29, %143 : vector<8x64xf32>
    %145 = vector.extract_strided_slice %144 {offsets = [0, 0], sizes = [8, 48], strides = [1, 1]} : vector<8x64xf32> to vector<8x48xf32>
    %146 = arith.negf %145 : vector<8x48xf32>
    %147 = math.exp %146 : vector<8x48xf32>
    %cst_34 = arith.constant 1.000000e+00 : f32
    %148 = vector.broadcast %cst_34 : f32 to vector<8x48xf32>
    %149 = arith.addf %148, %147 : vector<8x48xf32>
    %150 = arith.divf %148, %149 : vector<8x48xf32>
    %151 = vector.extract_strided_slice %144 {offsets = [0, 48], sizes = [8, 16], strides = [1, 1]} : vector<8x64xf32> to vector<8x16xf32>
    %152 = math.tanh %151 : vector<8x16xf32>
    %153 = vector.extract_strided_slice %150 {offsets = [0, 0], sizes = [8, 16], strides = [1, 1]} : vector<8x48xf32> to vector<8x16xf32>
    %154 = vector.extract_strided_slice %150 {offsets = [0, 16], sizes = [8, 16], strides = [1, 1]} : vector<8x48xf32> to vector<8x16xf32>
    %155 = vector.extract_strided_slice %150 {offsets = [0, 32], sizes = [8, 16], strides = [1, 1]} : vector<8x48xf32> to vector<8x16xf32>
    %156 = arith.mulf %154, %140 : vector<8x16xf32>
    %157 = arith.mulf %153, %152 : vector<8x16xf32>
    %158 = arith.addf %156, %157 : vector<8x16xf32>
    %159 = math.tanh %158 : vector<8x16xf32>
    %160 = arith.mulf %155, %159 : vector<8x16xf32>
    %cst_35 = arith.constant dense<0.000000e+00> : vector<8x64xf32>
    %161 = tpu.matmul %160, %5, %cst_35 {dimension_numbers = #tpu.dot_dimension_numbers<[1], [0], [0], [1], [0, 0, 1, 1], [], []>} : vector<8x16xf32>, vector<16x64xf32>, vector<8x64xf32> -> vector<8x64xf32>
    %162 = arith.addf %30, %161 : vector<8x64xf32>
    %163 = vector.extract_strided_slice %162 {offsets = [0, 0], sizes = [8, 48], strides = [1, 1]} : vector<8x64xf32> to vector<8x48xf32>
    %164 = arith.negf %163 : vector<8x48xf32>
    %165 = math.exp %164 : vector<8x48xf32>
    %cst_36 = arith.constant 1.000000e+00 : f32
    %166 = vector.broadcast %cst_36 : f32 to vector<8x48xf32>
    %167 = arith.addf %166, %165 : vector<8x48xf32>
    %168 = arith.divf %166, %167 : vector<8x48xf32>
    %169 = vector.extract_strided_slice %162 {offsets = [0, 48], sizes = [8, 16], strides = [1, 1]} : vector<8x64xf32> to vector<8x16xf32>
    %170 = math.tanh %169 : vector<8x16xf32>
    %171 = vector.extract_strided_slice %168 {offsets = [0, 0], sizes = [8, 16], strides = [1, 1]} : vector<8x48xf32> to vector<8x16xf32>
    %172 = vector.extract_strided_slice %168 {offsets = [0, 16], sizes = [8, 16], strides = [1, 1]} : vector<8x48xf32> to vector<8x16xf32>
    %173 = vector.extract_strided_slice %168 {offsets = [0, 32], sizes = [8, 16], strides = [1, 1]} : vector<8x48xf32> to vector<8x16xf32>
    %174 = arith.mulf %172, %158 : vector<8x16xf32>
    %175 = arith.mulf %171, %170 : vector<8x16xf32>
    %176 = arith.addf %174, %175 : vector<8x16xf32>
    %177 = math.tanh %176 : vector<8x16xf32>
    %178 = arith.mulf %173, %177 : vector<8x16xf32>
    %179 = tpu.concatenate %52, %70, %88, %106, %124, %142, %160, %178 in 0 : vector<8x16xf32>, vector<8x16xf32>, vector<8x16xf32>, vector<8x16xf32>, vector<8x16xf32>, vector<8x16xf32>, vector<8x16xf32>, vector<8x16xf32> -> vector<64x16xf32>
    %cst_37 = arith.constant dense<0.000000e+00> : vector<64x16xf32>
    %180 = tpu.matmul %179, %7, %cst_37 {dimension_numbers = #tpu.dot_dimension_numbers<[1], [0], [0], [1], [0, 0, 1, 1], [], []>} : vector<64x16xf32>, vector<16x16xf32>, vector<64x16xf32> -> vector<64x16xf32>
    %181 = vector.broadcast %8 : vector<1x16xf32> to vector<64x16xf32>
    %182 = arith.addf %180, %181 : vector<64x16xf32>
    %cst_38 = arith.constant 0.000000e+00 : f32
    %183 = vector.broadcast %cst_38 : f32 to vector<64x16xf32>
    %184 = arith.maximumf %182, %183 : vector<64x16xf32>
    %cst_39 = arith.constant dense<0.000000e+00> : vector<64x128xf32>
    %185 = tpu.matmul %184, %9, %cst_39 {dimension_numbers = #tpu.dot_dimension_numbers<[1], [0], [0], [1], [0, 0, 1, 1], [], []>} : vector<64x16xf32>, vector<16x128xf32>, vector<64x128xf32> -> vector<64x128xf32>
    %186 = vector.broadcast %10 : vector<1x128xf32> to vector<64x128xf32>
    %187 = arith.addf %185, %186 : vector<64x128xf32>
    %c0_40 = arith.constant 0 : index
    %c0_41 = arith.constant 0 : index
    %188 = vector.load %arg3[%c0_40, %c0_41] : memref<80x128xf32, #tpu.memory_space<vmem>>, vector<64x128xf32>
    tpu.vector_store %arg3[%c0_40, %c0_41], %187 {strides = array<i32>} : memref<80x128xf32, #tpu.memory_space<vmem>>, vector<64x128xf32>,
    %189 = tpu.concatenate %178, %176 in 0 : vector<8x16xf32>, vector<8x16xf32> -> vector<16x16xf32>
    %cst_42 = arith.constant 0.000000e+00 : f32
    %190 = vector.broadcast %cst_42 : f32 to vector<16x112xf32>
    %191 = tpu.concatenate %189, %190 in 1 : vector<16x16xf32>, vector<16x112xf32> -> vector<16x128xf32>
    %c64 = arith.constant 64 : index
    %c0_43 = arith.constant 0 : index
    %192 = vector.load %arg3[%c64, %c0_43] : memref<80x128xf32, #tpu.memory_space<vmem>>, vector<16x128xf32>
    tpu.vector_store %arg3[%c64, %c0_43], %191 {strides = array<i32>} : memref<80x128xf32, #tpu.memory_space<vmem>>, vector<16x128xf32>,
    return
  }
}

</mosaic_0001>

<bundles_post_ra>
// kernel: drqn_forward.1
= control target key start
LH: loop header
LB: loop body
LE: loop exit
PB: predicated region body
PF: predicated region fallthrough
CT: control target
= control target key end

     0   :  { %8 = vsyncpa [#allocation3], 0  ;;  %s1970_s12 = smov [#allocation2]   ;;  %s2263_s0 = inlined_call_operand.vmem [shape: f32[64,4], index: 0, kind: input, shape index: {}]   ;;  %s2264_s1 = inlined_call_operand.hbm [shape: f32[312,256], index: 1, kind: input, shape index: {}]   ;;  %s2265_s2 = inlined_call_operand.vmem [shape: f32[2,8,16], index: 2, kind: input, shape index: {}]   ;;  %s2266_s3 = inlined_call_operand.vmem [shape: f32[80,128], index: 3, kind: output, shape index: {}]  }
   0x1   :  { %s16_s13 = sshll.u32 %s1970_s12, 4  ;;  %s1946_s16 = scalar_lea.hbm %s2264_s1, 9984  ;;  %s17_s13 = int_to_ptr.vmem [resolvable:$true] %s16_s13 }
   0x2   :  { %p1947_p0 = scmp.ne.s32.totalorder %s2264_s1, %s1946_s16  ;;  %p1950_p1 = scmp.lt.u32.totalorder %s1946_s16, %s2264_s1 }
   0x4   :  { %p1952_p2 = pnand %p1950_p1, %p1947_p0 }
   0x6   :  { %1955 = shalt.err (!%p1952_p2)
}
   0x7   :  { %s1956_s21 = scalar_lea.vmem %s17_s13, 9984  ;;  %p1961_p4 = scmp.lt.s32.totalorder %s17_s13, %s17_s13 }
   0x8   :  { %p1957_p3 = scmp.ne.s32.totalorder %s17_s13, %s1956_s21  ;;  %p1962_p5 = scmp.lt.s32.totalorder %s1956_s21, %s1956_s21 }
   0xa   :  { %p1963_p6 = por %p1962_p5, %p1961_p4 }
   0xc   :  { %p1964_p7 = pnand %p1963_p6, %p1957_p3 }
   0xe   :  { %1967 = shalt.err (!%p1964_p7)
}
   0xf   :  { %s1971_s22 = smov 256   ;;  %s1972_s23 = smov 16  }
  0x10   :  { %22 = dma.hbm_to_vmem [thread:$0]  %s2264_s1, 9984, %s17_s13, [#allocation3], %s1971_s22, %s1971_s22, %s1972_s23  }
  0x11   :  { %1968 = dma.done.wait [#allocation3], 9984  }
  0x12   :  { %1969 = vsyncadd [#allocation3], 4294957312  ;;  %v1973_v0 = vmov 0.0   ;;  %v1974_v1 = vmov 0.0|0.0   ;;  %vm113_vm0 = vcmask 1043456   ;;  %v69_v4 = vld [vmem:[%s2263_s0] sm:$0xff]  ;;  %v78_v52 = vlaneseq }
  0x13   :  { %184 = vmatprep.mubr.f32.mxu0 %v1973_v0  ;;  %1802 = vmatprep.subr.bf16.mxu1 %v1974_v1  ;;  %v29_v2 = vld [vmem:[#allocation2 + $0x8] sm:$0xf]  ;;  %v28_v3 = vld [vmem:[#allocation2] sm:$0xf]  ;;  %vm88_vm1 = vcmask 31744   ;;  %v33_v6 = vld [vmem:[#allocation2 + $0x30] sm:$0xff] }
  0x14   :  { %1585 = vmatprep.subr.msk.mxu0 %vm113_vm0, %v29_v2  ;;  %v32_v5 = vld [vmem:[#allocation2 + $0x20] sm:$0xff]  ;;  %v70_v7 = vld [vmem:[%s2263_s0 + $0x8] sm:$0xff]  ;;  %v35_v10 = vld [vmem:[#allocation2 + $0x50] sm:$0xff]  ;;  %v79_v53 = vshrl.u32 %v78_v52, 7  ;;  %vm249_vm2 = vcmask 588800   ;;  %vm379_vm3 = vcmask 130048  }
  0x15   :  { %1586 = vmatpush1.msk.msra.mxu0 %vm113_vm0, %v28_v3  ;;  %v1803_v8 = vpack.c.bf16 %v33_v6, %v32_v5  ;;  %v34_v9 = vld [vmem:[#allocation2 + $0x40] sm:$0xff]  ;;  %v37_v13 = vld [vmem:[#allocation2 + $0x70] sm:$0xff]  ;;  %v72_v18 = vld [vmem:[%s2263_s0 + $0x18] sm:$0xff]  ;;  %vm1975_vm4 = vmmov 0   ;;  %s1976_s15 = smov 80  }
  0x16   :  { %1587 = vmatmul.mubr.msk.f32.vlgmr.msra.gmra.mrb[0].mxu0 %vm88_vm1, %v69_v4  ;;  %v1806_v11 = vpack.c.bf16 %v35_v10, %v34_v9  ;;  %v36_v12 = vld [vmem:[#allocation2 + $0x60] sm:$0xff]  ;;  %v71_v14 = vld [vmem:[%s2263_s0 + $0x10] sm:$0xff]  ;;  %v74_v26 = vld [vmem:[%s2263_s0 + $0x28] sm:$0xff]  ;;  %v80_v54 = vsub.s32 0, %v79_v53  ;;  %v84_v56 = vsub.s32 1, %v79_v53 }
  0x17   :  { %190 = vmatprep.mubr.f32.mxu0 %v1973_v0  ;;  %1804 = vmatpush1.bf16.msra.mxu1 %v1803_v8  ;;  %v1809_v15 = vpack.c.bf16 %v37_v13, %v36_v12  ;;  %v38_v16 = vld [vmem:[#allocation2 + $0x80] sm:$0xff]  ;;  %v39_v17 = vld [vmem:[#allocation2 + $0x90] sm:$0xff]  ;;  %v76_v34 = vld [vmem:[%s2263_s0 + $0x38] sm:$0xff] }
  0x18   :  { %1805 = vmatprep.subr.bf16.mxu1 %v1974_v1  ;;  %v1812_v19 = vpack.c.bf16 %v39_v17, %v38_v16  ;;  %v40_v20 = vld [vmem:[#allocation2 + $0xa0] sm:$0xff]  ;;  %v41_v21 = vld [vmem:[#allocation2 + $0xb0] sm:$0xff] }
  0x19   :  { %v73_v22 = vld [vmem:[%s2263_s0 + $0x20] sm:$0xff]  ;;  %v1815_v23 = vpack.c.bf16 %v41_v21, %v40_v20  ;;  %v43_v25 = vld [vmem:[#allocation2 + $0xd0] sm:$0xff] }
  0x1a   :  { %1588 = vmatmul.mubr.msk.f32.gmra.mrb[2].mxu0 %vm88_vm1, %v70_v7  ;;  %v42_v24 = vld [vmem:[#allocation2 + $0xc0] sm:$0xff]  ;;  %v45_v29 = vld [vmem:[#allocation2 + $0xf0] sm:$0xff] }
  0x1b   :  { %196 = vmatprep.mubr.f32.mxu0 %v1973_v0  ;;  %1807 = vmatpush1.bf16.msra.mxu1 %v1806_v11  ;;  %v1818_v27 = vpack.c.bf16 %v43_v25, %v42_v24  ;;  %v44_v28 = vld [vmem:[#allocation2 + $0xe0] sm:$0xff]  ;;  %v75_v30 = vld [vmem:[%s2263_s0 + $0x30] sm:$0xff] }
  0x1c   :  { %1808 = vmatprep.subr.bf16.mxu1 %v1974_v1  ;;  %v1821_v31 = vpack.c.bf16 %v45_v29, %v44_v28  ;;  %v46_v32 = vld [vmem:[#allocation2 + $0x100] sm:$0xff]  ;;  %v47_v33 = vld [vmem:[#allocation2 + $0x110] sm:$0xff] }
  0x1d   :  { %v1824_v35 = vpack.c.bf16 %v47_v33, %v46_v32  ;;  %v48_v36 = vld [vmem:[#allocation2 + $0x120] sm:$0xff]  ;;  %v49_v37 = vld [vmem:[#allocation2 + $0x130] sm:$0xff] }
  0x1e   :  { %1589 = vmatmul.mubr.msk.f32.gmra.mrb[4].mxu0 %vm88_vm1, %v71_v14  ;;  %v1827_v38 = vpack.c.bf16 %v49_v37, %v48_v36  ;;  %v50_v39 = vld [vmem:[#allocation2 + $0x140] sm:$0xff]  ;;  %v51_v40 = vld [vmem:[#allocation2 + $0x150] sm:$0xff] }
  0x1f   :  { %202 = vmatprep.mubr.f32.mxu0 %v1973_v0  ;;  %1810 = vmatpush1.bf16.msra.mxu1 %v1809_v15  ;;  %v1830_v41 = vpack.c.bf16 %v51_v40, %v50_v39  ;;  %v52_v42 = vld [vmem:[#allocation2 + $0x160] sm:$0xff]  ;;  %v53_v43 = vld [vmem:[#allocation2 + $0x170] sm:$0xff] }
  0x20   :  { %1811 = vmatprep.subr.bf16.mxu1 %v1974_v1  ;;  %v1833_v44 = vpack.c.bf16 %v53_v43, %v52_v42  ;;  %v54_v45 = vld [vmem:[#allocation2 + $0x180] sm:$0xff]  ;;  %v55_v46 = vld [vmem:[#allocation2 + $0x190] sm:$0xff] }
  0x21   :  { %v1836_v47 = vpack.c.bf16 %v55_v46, %v54_v45  ;;  %v56_v48 = vld [vmem:[#allocation2 + $0x1a0] sm:$0xff]  ;;  %v59_v50 = vld [vmem:[#allocation2 + $0x1d0] sm:$0xff] }
  0x22   :  { %1590 = vmatmul.mubr.msk.f32.gmra.mrb[6].mxu0 %vm88_vm1, %v72_v18  ;;  %v58_v49 = vld [vmem:[#allocation2 + $0x1c0] sm:$0xff]  ;;  %v31_v55 = vld [vmem:[#allocation2 + $0x10] ss:$8 sm:$0x3] }
  0x23   :  { %208 = vmatprep.mubr.f32.mxu0 %v1973_v0  ;;  %1813 = vmatpush1.bf16.msra.mxu1 %v1812_v19  ;;  %v1838_v51 = vpack.c.bf16 %v59_v50, %v58_v49  ;;  %v81_v57 = vrot.slane %v31_v55, %v80_v54  ;;  %v85_v58 = vrot.slane %v31_v55, %v84_v56  ;;  %v57_v45 = vld [vmem:[#allocation2 + $0x1b0] ss:$0 sm:$0xff]  ;;  %v60_v49 = vld [vmem:[#allocation2 + $0x1e0] sm:$0xff] }
  0x24   :  { %1814 = vmatprep.subr.bf16.mxu1 %v1974_v1  ;;  %v61_v50 = vld [vmem:[#allocation2 + $0x1f0] sm:$0xff] }
  0x25   :  { %1839 = vmatprep.subr.bf16.mxu0 %v1838_v51  ;;  %v2074_v52 = vpack.c.bf16 %v61_v50, %v60_v49 }
  0x26   :  { %1591 = vmatmul.mubr.msk.f32.gmra.mrb[8].mxu0 %vm88_vm1, %v73_v22 }
  0x27   :  { %214 = vmatprep.mubr.f32.mxu0 %v1973_v0  ;;  %1816 = vmatpush1.bf16.msra.mxu1 %v1815_v23 }
  0x28   :  { %1817 = vmatprep.subr.bf16.mxu1 %v1974_v1  ;;  %1841 = vmatpush3.bf16.msra.mxu0 %v1838_v51 }
  0x29   :  { %1842 = vmatprep.subr.bf16.mxu0 %v1974_v1 }
  0x2a   :  { %1592 = vmatmul.mubr.msk.f32.gmra.mrb[10].mxu0 %vm88_vm1, %v74_v26 }
  0x2b   :  { %220 = vmatprep.mubr.f32.mxu0 %v1973_v0  ;;  %1819 = vmatpush1.bf16.msra.mxu1 %v1818_v27 }
  0x2c   :  { %1820 = vmatprep.subr.bf16.mxu1 %v1974_v1 }
  0x2e   :  { %1593 = vmatmul.mubr.msk.f32.gmra.mrb[12].mxu0 %vm88_vm1, %v75_v30 }
  0x2f   :  { %226 = vmatprep.mubr.f32.mxu0 %v1973_v0  ;;  %1822 = vmatpush1.bf16.msra.mxu1 %v1821_v31 }
  0x30   :  { %1823 = vmatprep.subr.bf16.mxu1 %v1974_v1 }
  0x32   :  { %1594 = vmatmul.mubr.msk.f32.gmra.mrb[14].mxu0 %vm88_vm1, %v76_v34 }
  0x33   :  { %1825 = vmatpush1.bf16.msra.mxu1 %v1824_v35 }
  0x34   :  { %1826 = vmatprep.subr.bf16.mxu1 %v1974_v1 }
  0x37   :  { %1828 = vmatpush1.bf16.msra.mxu1 %v1827_v38 }
  0x38   :  { %1829 = vmatprep.subr.bf16.mxu1 %v1974_v1 }
  0x3b   :  { %1831 = vmatpush1.bf16.msra.mxu1 %v1830_v41 }
  0x3c   :  { %1832 = vmatprep.subr.bf16.mxu1 %v1974_v1 }
  0x3f   :  { %1834 = vmatpush1.bf16.msra.mxu1 %v1833_v44 }
  0x40   :  { %1835 = vmatprep.subr.bf16.mxu1 %v1974_v1 }
  0x43   :  { %1837 = vmatpush1.bf16.msra.mxu1 %v1836_v47 }
  0x44   :  { %322 = vmatprep.subr.mxu1 %v1973_v0 }
  0x47   :  { %323 = vmatpush1.msra.mxu1 %v56_v48 }
  0xe9   :  { %v186_v59 = vpop.f32.mrb[0].mxu0 }
  0xea   :  { %v187_v60 = vadd.f32 %v186_v59, %v81_v57  ;;  %v188_v61 = vpop.f32.mrb[1].mxu0 }
  0xeb   :  { %v189_v62 = vadd.f32 %v188_v61, %v85_v58 }
  0xec   :  { %v233_v3 = vmax.f32 %v187_v60, 0.0 }
  0xed   :  { %v234_v63 = vmax.f32 %v189_v62, 0.0  ;;  %v192_v2 = vpop.f32.mrb[2].mxu0 }
  0xee   :  { %v193_v4 = vadd.f32 %v192_v2, %v81_v57  ;;  %v194_v5 = vpop.f32.mrb[3].mxu0 }
  0xef   :  { %v195_v6 = vadd.f32 %v194_v5, %v85_v58  ;;  %1595 = vmatprep.mubr.msk.f32.mxu1 %vm249_vm2, %v234_v63 }
  0xf0   :  { %339 = vmatmul.mubr.f32.vlgmr.msra.gmra.mrb[0].mxu1 %v233_v3  ;;  %v235_v9 = vmax.f32 %v193_v4, 0.0 }
  0xf1   :  { %v236_v7 = vmax.f32 %v195_v6, 0.0  ;;  %v198_v8 = vpop.f32.mrb[4].mxu0 }
  0xf2   :  { %v199_v10 = vadd.f32 %v198_v8, %v81_v57  ;;  %v200_v11 = vpop.f32.mrb[5].mxu0 }
  0xf3   :  { %v201_v12 = vadd.f32 %v200_v11, %v85_v58  ;;  %1596 = vmatprep.mubr.msk.f32.mxu1 %vm249_vm2, %v236_v7  ;;  %v509_v11 = vld [vmem:[%s2265_s2] sm:$0xff] }
  0xf4   :  { %344 = vmatmul.mubr.f32.gmra.mrb[2].mxu1 %v235_v9  ;;  %v237_v15 = vmax.f32 %v199_v10, 0.0 }
  0xf5   :  { %v238_v13 = vmax.f32 %v201_v12, 0.0  ;;  %v204_v14 = vpop.f32.mrb[6].mxu0  ;;  %v62_v12 = vld [vmem:[#allocation2 + $0x200] ss:$0 sm:$0xff] }
  0xf6   :  { %v205_v16 = vadd.f32 %v204_v14, %v81_v57  ;;  %v206_v17 = vpop.f32.mrb[7].mxu0 }
  0xf7   :  { %v207_v18 = vadd.f32 %v206_v17, %v85_v58  ;;  %1597 = vmatprep.mubr.msk.f32.mxu1 %vm249_vm2, %v238_v13 }
  0xf8   :  { %349 = vmatmul.mubr.f32.gmra.mrb[4].mxu1 %v237_v15  ;;  %v239_v21 = vmax.f32 %v205_v16, 0.0 }
  0xf9   :  { %v240_v19 = vmax.f32 %v207_v18, 0.0  ;;  %v210_v20 = vpop.f32.mrb[8].mxu0 }
  0xfa   :  { %v211_v22 = vadd.f32 %v210_v20, %v81_v57  ;;  %v212_v23 = vpop.f32.mrb[9].mxu0 }
  0xfb   :  { %v213_v24 = vadd.f32 %v212_v23, %v85_v58  ;;  %1598 = vmatprep.mubr.msk.f32.mxu1 %vm249_vm2, %v240_v19 }
  0xfc   :  { %354 = vmatmul.mubr.f32.gmra.mrb[6].mxu1 %v239_v21  ;;  %v241_v27 = vmax.f32 %v211_v22, 0.0 }
  0xfd   :  { %v242_v25 = vmax.f32 %v213_v24, 0.0  ;;  %v216_v26 = vpop.f32.mrb[10].mxu0 }
  0xfe   :  { %v217_v28 = vadd.f32 %v216_v26, %v81_v57  ;;  %v218_v29 = vpop.f32.mrb[11].mxu0 }
  0xff   :  { %v219_v30 = vadd.f32 %v218_v29, %v85_v58  ;;  %1599 = vmatprep.mubr.msk.f32.mxu1 %vm249_vm2, %v242_v25 }
 0x100   :  { %359 = vmatmul.mubr.f32.gmra.mrb[8].mxu1 %v241_v27  ;;  %v243_v33 = vmax.f32 %v217_v28, 0.0 }
 0x101   :  { %v244_v31 = vmax.f32 %v219_v30, 0.0  ;;  %v222_v32 = vpop.f32.mrb[12].mxu0 }
 0x102   :  { %v223_v34 = vadd.f32 %v222_v32, %v81_v57  ;;  %v224_v35 = vpop.f32.mrb[13].mxu0 }
 0x103   :  { %v225_v36 = vadd.f32 %v224_v35, %v85_v58  ;;  %1600 = vmatprep.mubr.msk.f32.mxu1 %vm249_vm2, %v244_v31 }
 0x104   :  { %364 = vmatmul.mubr.f32.gmra.mrb[10].mxu1 %v243_v33  ;;  %v245_v39 = vmax.f32 %v223_v34, 0.0  ;;  %v1611_v33 = vld [vmem:[%s2265_s2 + $0x8] sm:$0xff]  ;;  %s1977_s2 = smov 96  }
 0x105   :  { %v246_v37 = vmax.f32 %v225_v36, 0.0  ;;  %v228_v38 = vpop.f32.mrb[14].mxu0 }
 0x106   :  { %v229_v40 = vadd.f32 %v228_v38, %v81_v57  ;;  %v230_v41 = vpop.f32.mrb[15].mxu0 }
 0x107   :  { %v231_v42 = vadd.f32 %v230_v41, %v85_v58  ;;  %1601 = vmatprep.mubr.msk.f32.mxu1 %vm249_vm2, %v246_v37 }
 0x108   :  { %369 = vmatmul.mubr.f32.gmra.mrb[12].mxu1 %v245_v39  ;;  %v247_v44 = vmax.f32 %v229_v40, 0.0 }
 0x109   :  { %v248_v43 = vmax.f32 %v231_v42, 0.0 }
 0x10b   :  { %1602 = vmatprep.mubr.msk.f32.mxu1 %vm249_vm2, %v248_v43 }
 0x10c   :  { %374 = vmatmul.mubr.f32.gmra.mrb[14].mxu1 %v247_v44 }
 0x1c3   :  { %v340_v46 = vpop.f32.mrb[0].mxu1 }
 0x1c4   :  { %v341_v47 = vadd.f32 %v340_v46, %v57_v45  ;;  %v342_v48 = vpop.f32.mrb[1].mxu1 }
 0x1c6   :  { %1702 = vmatprep.mubr.msk.f32.mxu0 %vm379_vm3, %v341_v47 }
 0x1c7   :  { %v345_v51 = vpop.f32.mrb[2].mxu1 }
 0x1c8   :  { %v346_v53 = vadd.f32 %v345_v51, %v57_v45  ;;  %v347_v54 = vpop.f32.mrb[3].mxu1 }
 0x1ca   :  { %1703 = vmatmul.mubr.msk.f32.vlgmr.msra.gmra.mrb[16].mxu0 %vm379_vm3, %v346_v53 }
 0x1cb   :  { %v350_v55 = vpop.f32.mrb[4].mxu1  ;;  %1844 = vmatpush3.bf16.msra.mxu0 %v2074_v52 }
 0x1cc   :  { %v351_v56 = vadd.f32 %v350_v55, %v57_v45  ;;  %v352_v57 = vpop.f32.mrb[5].mxu1  ;;  %1845 = vmatprep.subr.bf16.mxu0 %v1974_v1 }
 0x1ce   :  { %1705 = vmatprep.mubr.msk.f32.mxu0 %vm379_vm3, %v351_v56 }
 0x1cf   :  { %v355_v58 = vpop.f32.mrb[6].mxu1 }
 0x1d0   :  { %v356_v59 = vadd.f32 %v355_v58, %v57_v45  ;;  %v357_v60 = vpop.f32.mrb[7].mxu1 }
 0x1d2   :  { %1706 = vmatmul.mubr.msk.f32.gmra.mrb[18].mxu0 %vm379_vm3, %v356_v59 }
 0x1d3   :  { %v360_v61 = vpop.f32.mrb[8].mxu1 }
 0x1d4   :  { %v361_v62 = vadd.f32 %v360_v61, %v57_v45  ;;  %v362_v63 = vpop.f32.mrb[9].mxu1 }
 0x1d6   :  { %1708 = vmatprep.mubr.msk.f32.mxu0 %vm379_vm3, %v361_v62 }
 0x1d7   :  { %v365_v2 = vpop.f32.mrb[10].mxu1 }
 0x1d8   :  { %v366_v3 = vadd.f32 %v365_v2, %v57_v45  ;;  %v367_v4 = vpop.f32.mrb[11].mxu1 }
 0x1da   :  { %1709 = vmatmul.mubr.msk.f32.gmra.mrb[20].mxu0 %vm379_vm3, %v366_v3 }
 0x1db   :  { %v370_v5 = vpop.f32.mrb[12].mxu1 }
 0x1dc   :  { %v371_v6 = vadd.f32 %v370_v5, %v57_v45  ;;  %v372_v7 = vpop.f32.mrb[13].mxu1 }
 0x1de   :  { %1711 = vmatprep.mubr.msk.f32.mxu0 %vm379_vm3, %v371_v6 }
 0x1df   :  { %v375_v8 = vpop.f32.mrb[14].mxu1 }
 0x1e0   :  { %v376_v9 = vadd.f32 %v375_v8, %v57_v45  ;;  %v377_v10 = vpop.f32.mrb[15].mxu1 }
 0x1e2   :  { %1712 = vmatmul.mubr.msk.f32.gmra.mrb[22].mxu0 %vm379_vm3, %v376_v9 }
 0x1e3   :  { %1718 = vmatprep.mubr.msk.f32.mxu0 %vm1975_vm4, %v1973_v0 }
 0x1e6   :  { %1719 = vmatmul.mubr.msk.f32.vlgmr.msra.gmra.mrb[24].mxu0 %vm379_vm3, %v509_v11 }
 0x1e7   :  { %1847 = vmatpush3.bf16.msra.mxu0 %v2074_v52  ;;  %1725 = vmatprep.mubr.msk.f32.mxu0 %vm1975_vm4, %v1973_v0 }
 0x1e8   :  { %1848 = vmatprep.subr.bf16.mxu0 %v1974_v1 }
 0x29d   :  { %v1704_v13 = vpop.f32.mrb[16].mxu0 }
 0x29e   :  { %v476_v14 = vadd.f32 %v1704_v13, %v62_v12  ;;  %v470_v15 = vpop.f32.mrb[17].mxu0 }
 0x29f   :  { %v471_v28 = vadd.f32 %v470_v15, %v62_v12 }
 0x2a5   :  { %v1707_v16 = vpop.f32.mrb[18].mxu0 }
 0x2a6   :  { %v2095_v17 = vadd.f32 %v1707_v16, %v62_v12  ;;  %v480_v18 = vpop.f32.mrb[19].mxu0 }
 0x2a7   :  { %v2097_v19 = vadd.f32 %v480_v18, %v62_v12 }
 0x2ad   :  { %v1710_v20 = vpop.f32.mrb[20].mxu0 }
 0x2ae   :  { %v2099_v21 = vadd.f32 %v1710_v20, %v62_v12  ;;  %v490_v22 = vpop.f32.mrb[21].mxu0 }
 0x2af   :  { %v2101_v23 = vadd.f32 %v490_v22, %v62_v12 }
 0x2b5   :  { %v1713_v24 = vpop.f32.mrb[22].mxu0 }
 0x2b6   :  { %v2103_v25 = vadd.f32 %v1713_v24, %v62_v12  ;;  %v500_v26 = vpop.f32.mrb[23].mxu0 }
 0x2b7   :  { %v2105_v27 = vadd.f32 %v500_v26, %v62_v12 }
 0x2b9   :  { %v581_v29 = vpop.f32.mrb[24].mxu0 }
 0x2ba   :  { %v585_v30 = vadd.f32 %v581_v29, %v471_v28  ;;  %v1720_v31 = vpop.f32.mrb[25].mxu0 }
 0x2bc   :  { %1882 = vtanh.f32 %v585_v30  ;;  %v1613_v34 = vmul.f32 -1.442695, %v585_v30 }
 0x2be   :  { %1884 = vpow2.f32 %v1613_v34 }
 0x2c6   :  { %v1883_v32 = vpop.eup %1882 }
 0x2c7   :  { %599 = vrot.lane.b32.xlu0 %v1883_v32, %s1976_s15 }
 0x2c8   :  { %v1885_v35 = vpop.eup %1884 }
 0x2c9   :  { %v589_v36 = vadd.f32 1.0, %v1885_v35 }
 0x2cb   :  { %594 = vrot.lane.b32.xlu0 %v1611_v33, %s1972_s23  ;;  %1886 = vrcp.f32 %v589_v36 }
 0x2d5   :  { %v1887_v37 = vpop.eup %1886 }
 0x339   :  { %v600_v38 = vpop.permute.xlu0 %599 }
 0x33a   :  { %v602_v39 = vmul.f32 %v1887_v37, %v600_v38 }
 0x33c   :  { %604 = vrot.lane.b32.xlu1 %v602_v39, %s1972_s23 }
 0x33d   :  { %v595_v40 = vpop.permute.xlu0 %594 }
 0x33e   :  { %v597_v41 = vmul.f32 %v1887_v37, %v595_v40 }
 0x3ae   :  { %v605_v42 = vpop.permute.xlu1 %604 }
 0x3af   :  { %v607_v43 = vadd.f32 %v605_v42, %v597_v41 }
 0x3b1   :  { %1888 = vtanh.f32 %v607_v43 }
 0x3bb   :  { %v1889_v44 = vpop.eup %1888 }
 0x3bc   :  { %610 = vrot.lane.b32.xlu1 %v1889_v44, %s1972_s23 }
 0x42e   :  { %v611_v45 = vpop.permute.xlu1 %610 }
 0x42f   :  { %v613_v46 = vmul.f32 %v1887_v37, %v611_v45 }
 0x431   :  { %615 = vrot.lane.b32.xlu0 %v613_v46, %s1977_s2 }
 0x4a3   :  { %v2115_v47 = vpop.permute.xlu0 %615 }
 0x4a4   :  { %1726 = vmatmul.mubr.msk.f32.vlgmr.msra.gmra.mrb[26].mxu0 %vm379_vm3, %v2115_v47 }
 0x4a5   :  { %1850 = vmatpush3.bf16.msra.mxu0 %v2074_v52  ;;  %1732 = vmatprep.mubr.msk.f32.mxu0 %vm1975_vm4, %v1973_v0 }
 0x4a6   :  { %1851 = vmatprep.subr.bf16.mxu0 %v1974_v1 }
 0x577   :  { %v685_v48 = vpop.f32.mrb[26].mxu0 }
 0x578   :  { %v689_v49 = vadd.f32 %v685_v48, %v476_v14  ;;  %v1727_v50 = vpop.f32.mrb[27].mxu0 }
 0x57a   :  { %1890 = vtanh.f32 %v689_v49  ;;  %v1615_v53 = vmul.f32 -1.442695, %v689_v49 }
 0x57c   :  { %1892 = vpow2.f32 %v1615_v53 }
 0x584   :  { %v1891_v51 = vpop.eup %1890 }
 0x585   :  { %699 = vrot.lane.b32.xlu1 %v1891_v51, %s1976_s15 }
 0x586   :  { %v1893_v54 = vpop.eup %1892 }
 0x587   :  { %v693_v55 = vadd.f32 1.0, %v1893_v54 }
 0x589   :  { %1894 = vrcp.f32 %v693_v55 }
 0x593   :  { %v1895_v56 = vpop.eup %1894 }
 0x594   :  { %v697_v59 = vmul.f32 %v1895_v56, %v607_v43 }
 0x5f7   :  { %v700_v57 = vpop.permute.xlu1 %699 }
 0x5f8   :  { %v702_v58 = vmul.f32 %v1895_v56, %v700_v57 }
 0x5fa   :  { %704 = vrot.lane.b32.xlu0 %v702_v58, %s1972_s23 }
 0x66c   :  { %v705_v60 = vpop.permute.xlu0 %704 }
 0x66d   :  { %v707_v61 = vadd.f32 %v705_v60, %v697_v59 }
 0x66f   :  { %1896 = vtanh.f32 %v707_v61 }
 0x679   :  { %v1897_v62 = vpop.eup %1896 }
 0x67a   :  { %710 = vrot.lane.b32.xlu1 %v1897_v62, %s1972_s23 }
 0x6ec   :  { %v711_v63 = vpop.permute.xlu1 %710 }
 0x6ed   :  { %v713_v2 = vmul.f32 %v1895_v56, %v711_v63 }
 0x6ef   :  { %715 = vrot.lane.b32.xlu0 %v713_v2, %s1977_s2 }
 0x761   :  { %v2127_v3 = vpop.permute.xlu0 %715 }
 0x762   :  { %1733 = vmatmul.mubr.msk.f32.vlgmr.msra.gmra.mrb[28].mxu0 %vm379_vm3, %v2127_v3 }
 0x763   :  { %1853 = vmatpush3.bf16.msra.mxu0 %v2074_v52  ;;  %1739 = vmatprep.mubr.msk.f32.mxu0 %vm1975_vm4, %v1973_v0 }
 0x764   :  { %1854 = vmatprep.subr.bf16.mxu0 %v1974_v1 }
 0x835   :  { %v785_v4 = vpop.f32.mrb[28].mxu0 }
 0x836   :  { %v789_v5 = vadd.f32 %v785_v4, %v2097_v19  ;;  %v1734_v6 = vpop.f32.mrb[29].mxu0 }
 0x838   :  { %1898 = vtanh.f32 %v789_v5  ;;  %v1617_v8 = vmul.f32 -1.442695, %v789_v5 }
 0x83a   :  { %1900 = vpow2.f32 %v1617_v8 }
 0x842   :  { %v1899_v7 = vpop.eup %1898 }
 0x843   :  { %799 = vrot.lane.b32.xlu1 %v1899_v7, %s1976_s15 }
 0x844   :  { %v1901_v9 = vpop.eup %1900 }
 0x845   :  { %v793_v10 = vadd.f32 1.0, %v1901_v9 }
 0x847   :  { %1902 = vrcp.f32 %v793_v10 }
 0x851   :  { %v1903_v11 = vpop.eup %1902 }
 0x852   :  { %v797_v14 = vmul.f32 %v1903_v11, %v707_v61 }
 0x8b5   :  { %v800_v12 = vpop.permute.xlu1 %799 }
 0x8b6   :  { %v802_v13 = vmul.f32 %v1903_v11, %v800_v12 }
 0x8b8   :  { %804 = vrot.lane.b32.xlu0 %v802_v13, %s1972_s23 }
 0x92a   :  { %v805_v15 = vpop.permute.xlu0 %804 }
 0x92b   :  { %v807_v16 = vadd.f32 %v805_v15, %v797_v14 }
 0x92d   :  { %1904 = vtanh.f32 %v807_v16 }
 0x937   :  { %v1905_v18 = vpop.eup %1904 }
 0x938   :  { %810 = vrot.lane.b32.xlu1 %v1905_v18, %s1972_s23 }
 0x9aa   :  { %v811_v19 = vpop.permute.xlu1 %810 }
 0x9ab   :  { %v813_v20 = vmul.f32 %v1903_v11, %v811_v19 }
 0x9ad   :  { %815 = vrot.lane.b32.xlu0 %v813_v20, %s1977_s2 }
 0xa1f   :  { %v2140_v22 = vpop.permute.xlu0 %815 }
 0xa20   :  { %1740 = vmatmul.mubr.msk.f32.vlgmr.msra.gmra.mrb[30].mxu0 %vm379_vm3, %v2140_v22 }
 0xa21   :  { %1856 = vmatpush3.bf16.msra.mxu0 %v2074_v52  ;;  %1746 = vmatprep.mubr.msk.f32.mxu0 %vm1975_vm4, %v1973_v0 }
 0xa22   :  { %1857 = vmatprep.subr.bf16.mxu0 %v1974_v1 }
 0xaf3   :  { %v885_v24 = vpop.f32.mrb[30].mxu0 }
 0xaf4   :  { %v889_v26 = vadd.f32 %v885_v24, %v2095_v17  ;;  %v1741_v28 = vpop.f32.mrb[31].mxu0 }
 0xaf6   :  { %1906 = vtanh.f32 %v889_v26  ;;  %v1619_v30 = vmul.f32 -1.442695, %v889_v26 }
 0xaf8   :  { %1908 = vpow2.f32 %v1619_v30 }
 0xb00   :  { %v1907_v29 = vpop.eup %1906 }
 0xb01   :  { %899 = vrot.lane.b32.xlu1 %v1907_v29, %s1976_s15 }
 0xb02   :  { %v1909_v31 = vpop.eup %1908 }
 0xb03   :  { %v893_v32 = vadd.f32 1.0, %v1909_v31  ;;  %v63_v31 = vld [vmem:[#allocation2 + $0x210] sm:$0xff] }
 0xb05   :  { %1910 = vrcp.f32 %v893_v32  ;;  %v64_v32 = vld [vmem:[#allocation2 + $0x220] sm:$0xff] }
 0xb0f   :  { %v1911_v33 = vpop.eup %1910 }
 0xb10   :  { %v897_v36 = vmul.f32 %v1911_v33, %v807_v16 }
 0xb73   :  { %v900_v34 = vpop.permute.xlu1 %899 }
 0xb74   :  { %v902_v35 = vmul.f32 %v1911_v33, %v900_v34 }
 0xb76   :  { %904 = vrot.lane.b32.xlu0 %v902_v35, %s1972_s23 }
 0xbe8   :  { %v905_v37 = vpop.permute.xlu0 %904 }
 0xbe9   :  { %v907_v38 = vadd.f32 %v905_v37, %v897_v36  ;;  %v66_v37 = vld [vmem:[#allocation2 + $0x240] sm:$0xff] }
 0xbeb   :  { %1912 = vtanh.f32 %v907_v38 }
 0xbf5   :  { %v1913_v17 = vpop.eup %1912 }
 0xbf6   :  { %910 = vrot.lane.b32.xlu1 %v1913_v17, %s1972_s23 }
 0xc68   :  { %v911_v39 = vpop.permute.xlu1 %910 }
 0xc69   :  { %v913_v40 = vmul.f32 %v1911_v33, %v911_v39  ;;  %v1866_v33 = vpack.c.bf16 %v64_v32, %v63_v31 }
 0xc6b   :  { %915 = vrot.lane.b32.xlu0 %v913_v40, %s1977_s2 }
 0xcdd   :  { %v2153_v41 = vpop.permute.xlu0 %915 }
 0xcde   :  { %1747 = vmatmul.mubr.msk.f32.vlgmr.msra.gmra.mrb[32].mxu0 %vm379_vm3, %v2153_v41 }
 0xcdf   :  { %1859 = vmatpush3.bf16.msra.mxu0 %v2074_v52  ;;  %1753 = vmatprep.mubr.msk.f32.mxu0 %vm1975_vm4, %v1973_v0 }
 0xce0   :  { %1860 = vmatprep.subr.bf16.mxu0 %v1974_v1 }
 0xdb1   :  { %v985_v42 = vpop.f32.mrb[32].mxu0 }
 0xdb2   :  { %v989_v43 = vadd.f32 %v985_v42, %v2101_v23  ;;  %v1748_v44 = vpop.f32.mrb[33].mxu0 }
 0xdb4   :  { %1914 = vtanh.f32 %v989_v43  ;;  %v1621_v46 = vmul.f32 -1.442695, %v989_v43 }
 0xdb6   :  { %1916 = vpow2.f32 %v1621_v46 }
 0xdbe   :  { %v1915_v45 = vpop.eup %1914 }
 0xdbf   :  { %999 = vrot.lane.b32.xlu1 %v1915_v45, %s1976_s15 }
 0xdc0   :  { %v1917_v48 = vpop.eup %1916 }
 0xdc1   :  { %v993_v49 = vadd.f32 1.0, %v1917_v48 }
 0xdc3   :  { %1918 = vrcp.f32 %v993_v49 }
 0xdcd   :  { %v1919_v50 = vpop.eup %1918 }
 0xdce   :  { %v997_v54 = vmul.f32 %v1919_v50, %v907_v38  ;;  %v67_v38 = vld [vmem:[#allocation2 + $0x250] sm:$0xff] }
 0xdcf   :  { %v1870_v17 = vpack.c.bf16 %v67_v38, %v66_v37 }
 0xdd1   :  { %1871 = vmatprep.subr.bf16.mxu1 %v1870_v17 }
 0xdd2   :  { %1873 = vmatpush3.bf16.msra.mxu1 %v1870_v17 }
 0xe31   :  { %v1000_v51 = vpop.permute.xlu1 %999 }
 0xe32   :  { %v1002_v53 = vmul.f32 %v1919_v50, %v1000_v51 }
 0xe34   :  { %1004 = vrot.lane.b32.xlu0 %v1002_v53, %s1972_s23 }
 0xea6   :  { %v1005_v55 = vpop.permute.xlu0 %1004 }
 0xea7   :  { %v1007_v56 = vadd.f32 %v1005_v55, %v997_v54 }
 0xea9   :  { %1920 = vtanh.f32 %v1007_v56 }
 0xeb3   :  { %v1921_v23 = vpop.eup %1920 }
 0xeb4   :  { %1010 = vrot.lane.b32.xlu1 %v1921_v23, %s1972_s23 }
 0xf26   :  { %v1011_v57 = vpop.permute.xlu1 %1010 }
 0xf27   :  { %v1013_v58 = vmul.f32 %v1919_v50, %v1011_v57 }
 0xf29   :  { %1015 = vrot.lane.b32.xlu0 %v1013_v58, %s1977_s2 }
 0xf9b   :  { %v2166_v59 = vpop.permute.xlu0 %1015 }
 0xf9c   :  { %1754 = vmatmul.mubr.msk.f32.vlgmr.msra.gmra.mrb[34].mxu0 %vm379_vm3, %v2166_v59 }
 0xf9d   :  { %1862 = vmatpush3.bf16.msra.mxu0 %v2074_v52  ;;  %1760 = vmatprep.mubr.msk.f32.mxu0 %vm1975_vm4, %v1973_v0 }
 0xf9e   :  { %1863 = vmatprep.subr.bf16.mxu0 %v1974_v1 }
0x106f   :  { %v1085_v60 = vpop.f32.mrb[34].mxu0 }
0x1070   :  { %v1089_v61 = vadd.f32 %v1085_v60, %v2099_v21  ;;  %v1755_v62 = vpop.f32.mrb[35].mxu0 }
0x1072   :  { %1922 = vtanh.f32 %v1089_v61  ;;  %v1623_v2 = vmul.f32 -1.442695, %v1089_v61 }
0x1074   :  { %1924 = vpow2.f32 %v1623_v2 }
0x107c   :  { %v1923_v63 = vpop.eup %1922 }
0x107d   :  { %1099 = vrot.lane.b32.xlu1 %v1923_v63, %s1976_s15 }
0x107e   :  { %v1925_v4 = vpop.eup %1924 }
0x107f   :  { %v1093_v5 = vadd.f32 1.0, %v1925_v4  ;;  %v68_v4 = vld [vmem:[#allocation2 + $0x260] ss:$0 sm:$0xff] }
0x1081   :  { %1926 = vrcp.f32 %v1093_v5 }
0x108b   :  { %v1927_v6 = vpop.eup %1926 }
0x108c   :  { %v1097_v9 = vmul.f32 %v1927_v6, %v1007_v56 }
0x10ef   :  { %v1100_v7 = vpop.permute.xlu1 %1099 }
0x10f0   :  { %v1102_v8 = vmul.f32 %v1927_v6, %v1100_v7 }
0x10f2   :  { %1104 = vrot.lane.b32.xlu0 %v1102_v8, %s1972_s23 }
0x1164   :  { %v1105_v1 = vpop.permute.xlu0 %1104 }
0x1165   :  { %v1107_v10 = vadd.f32 %v1105_v1, %v1097_v9 }
0x1167   :  { %1928 = vtanh.f32 %v1107_v10 }
0x1171   :  { %v1929_v21 = vpop.eup %1928 }
0x1172   :  { %1110 = vrot.lane.b32.xlu1 %v1929_v21, %s1972_s23 }
0x11e4   :  { %v1111_v11 = vpop.permute.xlu1 %1110 }
0x11e5   :  { %v1113_v12 = vmul.f32 %v1927_v6, %v1111_v11 }
0x11e7   :  { %1115 = vrot.lane.b32.xlu0 %v1113_v12, %s1977_s2 }
0x1259   :  { %v1116_v13 = vpop.permute.xlu0 %1115 }
0x125a   :  { %1761 = vmatmul.mubr.msk.f32.vlgmr.msra.gmra.mrb[36].mxu0 %vm379_vm3, %v1116_v13 }
0x125b   :  { %1865 = vmatpush3.bf16.msra.mxu0 %v2074_v52  ;;  %1767 = vmatprep.mubr.msk.f32.mxu0 %vm1975_vm4, %v1973_v0 }
0x125c   :  { %1867 = vmatprep.subr.bf16.mxu0 %v1866_v33 }
0x132d   :  { %v1185_v14 = vpop.f32.mrb[36].mxu0 }
0x132e   :  { %v1189_v15 = vadd.f32 %v1185_v14, %v2105_v27  ;;  %v1762_v16 = vpop.f32.mrb[37].mxu0 }
0x1330   :  { %1930 = vtanh.f32 %v1189_v15  ;;  %v1625_v19 = vmul.f32 -1.442695, %v1189_v15 }
0x1332   :  { %1932 = vpow2.f32 %v1625_v19 }
0x133a   :  { %v1931_v18 = vpop.eup %1930 }
0x133b   :  { %1199 = vrot.lane.b32.xlu1 %v1931_v18, %s1976_s15 }
0x133c   :  { %v1933_v20 = vpop.eup %1932 }
0x133d   :  { %v1193_v24 = vadd.f32 1.0, %v1933_v20 }
0x133f   :  { %1934 = vrcp.f32 %v1193_v24 }
0x1349   :  { %v1935_v26 = vpop.eup %1934 }
0x134a   :  { %v1197_v52 = vmul.f32 %v1935_v26, %v1107_v10 }
0x13ad   :  { %v1200_v28 = vpop.permute.xlu1 %1199 }
0x13ae   :  { %v1202_v29 = vmul.f32 %v1935_v26, %v1200_v28 }
0x13b0   :  { %1204 = vrot.lane.b32.xlu0 %v1202_v29, %s1972_s23 }
0x1422   :  { %v1205_v0 = vpop.permute.xlu0 %1204 }
0x1423   :  { %v2186_v30 = vadd.f32 %v1205_v0, %v1197_v52 }
0x1425   :  { %1936 = vtanh.f32 %v2186_v30 }
0x142f   :  { %v1937_v27 = vpop.eup %1936 }
0x1430   :  { %1210 = vrot.lane.b32.xlu1 %v1937_v27, %s1972_s23 }
0x14a2   :  { %v1211_v34 = vpop.permute.xlu1 %1210 }
0x14a3   :  { %v1213_v35 = vmul.f32 %v1935_v26, %v1211_v34 }
0x14a5   :  { %1215 = vrot.lane.b32.xlu0 %v1213_v35, %s1977_s2 }
0x1517   :  { %v1216_v36 = vpop.permute.xlu0 %1215 }
0x1518   :  { %1768 = vmatmul.mubr.msk.f32.vlgmr.msra.gmra.mrb[38].mxu0 %vm379_vm3, %v1216_v36 }
0x1519   :  { %1869 = vmatpush3.bf16.msra.mxu0 %v1866_v33  ;;  %1774 = vmatprep.mubr.msk.f32.mxu0 %vm379_vm3, %v2115_v47 }
0x151c   :  { %1775 = vmatmul.mubr.msk.f32.vlgmr.msra.gmra.mrb[40].mxu0 %vm379_vm3, %v2127_v3 }
0x151d   :  { %1777 = vmatprep.mubr.msk.f32.mxu0 %vm379_vm3, %v2140_v22  ;;  %v2205_v22 = vld [vmem:[#allocation2 + $0x230] ss:$0 sm:$0xff] }
0x1520   :  { %1778 = vmatmul.mubr.msk.f32.gmra.mrb[42].mxu0 %vm379_vm3, %v2153_v41 }
0x1521   :  { %1780 = vmatprep.mubr.msk.f32.mxu0 %vm379_vm3, %v2166_v59 }
0x1524   :  { %1781 = vmatmul.mubr.msk.f32.gmra.mrb[44].mxu0 %vm379_vm3, %v1116_v13 }
0x1525   :  { %1783 = vmatprep.mubr.msk.f32.mxu0 %vm379_vm3, %v1216_v36 }
0x15eb   :  { %v1285_v47 = vpop.f32.mrb[38].mxu0 }
0x15ec   :  { %v1289_v3 = vadd.f32 %v1285_v47, %v2103_v25  ;;  %v1769_v39 = vpop.f32.mrb[39].mxu0 }
0x15ee   :  { %1938 = vtanh.f32 %v1289_v3  ;;  %v1627_v59 = vmul.f32 -1.442695, %v1289_v3 }
0x15ef   :  { %v1776_v40 = vpop.f32.mrb[40].mxu0 }
0x15f0   :  { %v1391_v41 = vadd.f32 %v1776_v40, %v2205_v22  ;;  %v1385_v42 = vpop.f32.mrb[41].mxu0  ;;  %1940 = vpow2.f32 %v1627_v59 }
0x15f1   :  { %v1386_v43 = vadd.f32 %v1385_v42, %v2205_v22 }
0x15f2   :  { %v1425_v46 = vmax.f32 %v1391_v41, 0.0 }
0x15f3   :  { %v1424_v44 = vmax.f32 %v1386_v43, 0.0  ;;  %v1779_v45 = vpop.f32.mrb[42].mxu0 }
0x15f4   :  { %v1401_v48 = vadd.f32 %v1779_v45, %v2205_v22  ;;  %v1395_v49 = vpop.f32.mrb[43].mxu0 }
0x15f5   :  { %v1396_v50 = vadd.f32 %v1395_v49, %v2205_v22  ;;  %1790 = vmatprep.mubr.msk.f32.mxu1 %vm379_vm3, %v1424_v44 }
0x15f6   :  { %1791 = vmatmul.mubr.msk.f32.vlgmr.msra.gmra.mrb[16].mxu1 %vm379_vm3, %v1425_v46  ;;  %v1427_v54 = vmax.f32 %v1401_v48, 0.0 }
0x15f7   :  { %v1426_v25 = vmax.f32 %v1396_v50, 0.0  ;;  %v1782_v51 = vpop.f32.mrb[44].mxu0 }
0x15f8   :  { %v1939_v53 = vpop.eup %1938  ;;  %v1411_v55 = vadd.f32 %v1782_v51, %v2205_v22  ;;  %v1405_v56 = vpop.f32.mrb[45].mxu0 }
0x15f9   :  { %v1406_v23 = vadd.f32 %v1405_v56, %v2205_v22  ;;  %1299 = vrot.lane.b32.xlu1 %v1939_v53, %s1976_s15  ;;  %1793 = vmatprep.mubr.msk.f32.mxu1 %vm379_vm3, %v1426_v25 }
0x15fa   :  { %1794 = vmatmul.mubr.msk.f32.gmra.mrb[18].mxu1 %vm379_vm3, %v1427_v54  ;;  %v1429_v58 = vmax.f32 %v1411_v55, 0.0  ;;  %v1941_v60 = vpop.eup %1940 }
0x15fb   :  { %v1428_v57 = vmax.f32 %v1406_v23, 0.0  ;;  %v1293_v61 = vadd.f32 1.0, %v1941_v60 }
0x15fd   :  { %1796 = vmatprep.mubr.msk.f32.mxu1 %vm379_vm3, %v1428_v57  ;;  %1942 = vrcp.f32 %v1293_v61 }
0x15fe   :  { %1797 = vmatmul.mubr.msk.f32.gmra.mrb[20].mxu1 %vm379_vm3, %v1429_v58 }
0x1607   :  { %v1943_v62 = vpop.eup %1942 }
0x1608   :  { %v1297_v15 = vmul.f32 %v1943_v62, %v2186_v30 }
0x166b   :  { %v1300_v63 = vpop.permute.xlu1 %1299 }
0x166c   :  { %v1302_v2 = vmul.f32 %v1943_v62, %v1300_v63 }
0x166e   :  { %1304 = vrot.lane.b32.xlu0 %v1302_v2, %s1972_s23 }
0x16c9   :  { %v1792_v5 = vpop.f32.mrb[16].mxu1 }
0x16ca   :  { %v1528_v6 = vadd.f32 %v1792_v5, %v68_v4  ;;  %v1522_v7 = vpop.f32.mrb[17].mxu1 }
0x16cb   :  { %v1523_v8 = vadd.f32 %v1522_v7, %v68_v4 }
0x16cc   :  { %1562 = vst [vmem:[%s2266_s3 + $0x8] sm:$0xff] %v1528_v6 }
0x16cd   :  { %1561 = vst [vmem:[%s2266_s3] sm:$0xff] %v1523_v8  ;;  %v1795_v9 = vpop.f32.mrb[18].mxu1 }
0x16ce   :  { %v1538_v1 = vadd.f32 %v1795_v9, %v68_v4  ;;  %v1532_v10 = vpop.f32.mrb[19].mxu1 }
0x16cf   :  { %v1533_v21 = vadd.f32 %v1532_v10, %v68_v4 }
0x16d0   :  { %1564 = vst [vmem:[%s2266_s3 + $0x18] sm:$0xff] %v1538_v1 }
0x16d1   :  { %1563 = vst [vmem:[%s2266_s3 + $0x10] sm:$0xff] %v1533_v21  ;;  %v1798_v11 = vpop.f32.mrb[20].mxu1 }
0x16d2   :  { %v1548_v12 = vadd.f32 %v1798_v11, %v68_v4  ;;  %v1542_v13 = vpop.f32.mrb[21].mxu1 }
0x16d3   :  { %v1543_v14 = vadd.f32 %v1542_v13, %v68_v4 }
0x16d4   :  { %1566 = vst [vmem:[%s2266_s3 + $0x28] sm:$0xff] %v1548_v12 }
0x16d5   :  { %1565 = vst [vmem:[%s2266_s3 + $0x20] sm:$0xff] %v1543_v14 }
0x16e0   :  { %v1305_v16 = vpop.permute.xlu0 %1304 }
0x16e1   :  { %v1307_v18 = vadd.f32 %v1305_v16, %v1297_v15 }
0x16e3   :  { %1944 = vtanh.f32 %v1307_v18 }
0x16ed   :  { %v1945_v19 = vpop.eup %1944 }
0x16ee   :  { %1310 = vrot.lane.b32.xlu1 %v1945_v19, %s1972_s23 }
0x16f2   :  { %1570 = vrot.lane.b32.xlu1 %v1307_v18, %s1972_s23 }
0x1760   :  { %v1311_v20 = vpop.permute.xlu1 %1310 }
0x1761   :  { %v1313_v24 = vmul.f32 %v1943_v62, %v1311_v20 }
0x1763   :  { %1315 = vrot.lane.b32.xlu0 %v1313_v24, %s1977_s2 }
0x1764   :  { %v1571_v26 = vpop.permute.xlu1 %1570 }
0x1767   :  { %1572 = vrot.lane.b32.xlu0 %v1571_v26, %s1977_s2 }
0x17d5   :  { %v1316_v28 = vpop.permute.xlu0 %1315 }
0x17d6   :  { %v1576_v29 = vsel %vm379_vm3, %v1316_v28, 0.0  ;;  %1784 = vmatmul.mubr.msk.f32.gmra.mrb[46].mxu0 %vm379_vm3, %v1316_v28 }
0x17d7   :  { %1578 = vst [vmem:[%s2266_s3 + $0x40] sm:$0xff] %v1576_v29 }
0x17d9   :  { %v1573_v52 = vpop.permute.xlu0 %1572 }
0x17da   :  { %v1577_v0 = vsel %vm379_vm3, %v1573_v52, 0.0 }
0x17db   :  { %1579 = vst [vmem:[%s2266_s3 + $0x48] sm:$0xff] %v1577_v0 }
0x18a9   :  { %v1785_v30 = vpop.f32.mrb[46].mxu0 }
0x18aa   :  { %v1421_v27 = vadd.f32 %v1785_v30, %v2205_v22  ;;  %v1415_v31 = vpop.f32.mrb[47].mxu0 }
0x18ab   :  { %v1416_v32 = vadd.f32 %v1415_v31, %v2205_v22 }
0x18ac   :  { %v1431_v34 = vmax.f32 %v1421_v27, 0.0 }
0x18ad   :  { %v1430_v33 = vmax.f32 %v1416_v32, 0.0 }
0x18af   :  { %1799 = vmatprep.mubr.msk.f32.mxu1 %vm379_vm3, %v1430_v33 }
0x18b0   :  { %1800 = vmatmul.mubr.msk.f32.gmra.mrb[22].mxu1 %vm379_vm3, %v1431_v34 }
0x1983   :  { %v1801_v35 = vpop.f32.mrb[22].mxu1 }
0x1984   :  { %v1558_v36 = vadd.f32 %v1801_v35, %v68_v4  ;;  %v1552_v37 = vpop.f32.mrb[23].mxu1 }
0x1985   :  { %v1553_v38 = vadd.f32 %v1552_v37, %v68_v4 }
0x1986   :  { %1568 = vst [vmem:[%s2266_s3 + $0x38] sm:$0xff] %v1558_v36 }
0x1987   :  { %1567 = vst [vmem:[%s2266_s3 + $0x30] sm:$0xff] %v1553_v38 }
0x1988   :  { %1584 = vsyncpa [#allocation3], 1 }

</bundles_post_ra>
